<compile_context>
chip_gen: v5e
topology: v5e:2x2
jax: 0.10.0
libtpu: 0.0.40
codegen_flags: <defaults>
</compile_context>

<pallas_src>
import functools

import jax
import jax.numpy as jnp
import numpy as np
from jax.experimental import pallas as pl
from jax.experimental.pallas import tpu as pltpu


def _round_up(x, m):
    return (x + m - 1) // m * m


def _class_branch_2_kernel(w3_ref, fea_ref, wt_ref, b_ref, out_ref):
    ci = pl.program_id(1)

    # First C step for this batch row: seed the resident output block with the
    # folded classifier bias.
    @pl.when(ci == 0)
    def _init():
        out_ref[...] = b_ref[...]

    # proj[j, s] = sum_{c in tile} w_foldT[j, c] * fea[c, s]
    # fea tile is the MXU RHS in natural (channel, spatial) layout: contraction
    # runs over its sublane dim, so no in-kernel transpose of the big tile.
    proj = jnp.dot(wt_ref[...], fea_ref[0],
                   preferred_element_type=jnp.float32)            # (n_out, S)

    # contrib[0, j] = sum_s w3[0, s] * proj[j, s]   (tiny, flash-style einsum)
    contrib = jnp.einsum("xs,js->xj", w3_ref[0], proj,
                         preferred_element_type=jnp.float32)      # (1, n_out)

    out_ref[...] += contrib[None]


def prepare_params(params):
    """One-time eval-mode fold: Linear(2048,256)->Dropout(id)->Linear(256,2).

    (x @ W1^T + b1) @ W2^T + b2 == x @ (W2 W1)^T + (b1 @ W2^T + b2).
    Call once, outside the per-step path, so W1 (2 MiB) is never re-read.
    Exact only in eval mode (Dropout = identity).
    """
    wt = params["w2"] @ params["w1"]                      # (2, 2048), lane-dense in C
    b = params["b1"] @ params["w2"].T + params["b2"]      # (2,)
    return {"wT": wt, "b": b.reshape(1, 1, -1)}


@functools.partial(jax.jit, static_argnames=("block_c",))
def class_branch_2_forward(x_spacial_atten_p, x_spacial_atten_n, x_w, x_fea,
                           folded_params, *, block_c=512):
    """x_* are NCHW float32 arrays; x_w is accepted but unused (as in PyTorch)."""
    del x_w  # unused by the original forward pass
    B, C, H, Wd = x_fea.shape
    S = H * Wd
    fea = x_fea.reshape(B, C, S)

    # Spatial-attention weights folded with the 1/S mean:
    #   w3[b, s] = (sum_c cat(p, n)[b, c, s] + 1) / S      (tiny; fuses upstream)
    atten = (x_spacial_atten_p.reshape(B, -1, S).sum(axis=1)
             + x_spacial_atten_n.reshape(B, -1, S).sum(axis=1))    # (B, S)
    w3 = ((atten + 1.0) * (1.0 / S)).reshape(B, 1, S)

    wt = folded_params["wT"]          # (n_out, C)
    bias = folded_params["b"]         # (1, 1, n_out)
    n_out = wt.shape[0]

    block_c = min(block_c, C)
    assert C % block_c == 0, "block_c must divide C"
    grid = (B, C // block_c)          # batch 'parallel' (>=2 blocks), C reduction last

    # VMEM budget from actual padded, double-buffered tile sizes (+ slack).
    s_pad = _round_up(S, 128)
    fea_buf = block_c * s_pad * 4
    wt_buf = _round_up(n_out, 8) * block_c * 4
    w3_buf = 8 * s_pad * 4
    small_buf = 8 * 128 * 4                     # bias + output blocks (padded)
    vmem_bytes = 2 * (fea_buf + wt_buf + w3_buf + 2 * small_buf)
    vmem_limit = int(min(max(4 * vmem_bytes, 8 * 1024 * 1024), 64 * 1024 * 1024))

    flops = 2 * B * n_out * C * S + 2 * B * n_out * S * (C // block_c)
    bytes_accessed = 4 * (fea.size + B * n_out * C + w3.size + bias.size + B * n_out)

    out3 = pl.pallas_call(
        _class_branch_2_kernel,
        out_shape=jax.ShapeDtypeStruct((B, 1, n_out), jnp.float32),
        grid=grid,
        in_specs=[
            pl.BlockSpec((1, 1, S), lambda bi, ci: (bi, 0, 0)),          # w3
            pl.BlockSpec((1, block_c, S), lambda bi, ci: (bi, ci, 0)),   # fea
            pl.BlockSpec((n_out, block_c), lambda bi, ci: (0, ci)),      # w_foldT
            pl.BlockSpec((1, 1, n_out), lambda bi, ci: (0, 0, 0)),       # bias
        ],
        out_specs=pl.BlockSpec((1, 1, n_out), lambda bi, ci: (bi, 0, 0)),
        compiler_params=pltpu.CompilerParams(
            dimension_semantics=("parallel", "arbitrary"),
            vmem_limit_bytes=vmem_limit,
        ),
        cost_estimate=pl.CostEstimate(
            flops=flops, transcendentals=0, bytes_accessed=bytes_accessed),
    )(w3, fea, wt, bias)
    return out3.reshape(B, n_out)


def init_params(key):
    """Deterministic init matching nn.Linear shapes (uniform +/- 1/sqrt(fan_in))."""
    k1, k2, k3, k4 = jax.random.split(key, 4)
    lim1 = 1.0 / np.sqrt(2048.0)
    lim2 = 1.0 / np.sqrt(256.0)
    return {
        "w1": jax.random.uniform(k1, (256, 2048), jnp.float32, -lim1, lim1),
        "b1": jax.random.uniform(k2, (256,), jnp.float32, -lim1, lim1),
        "w2": jax.random.uniform(k3, (2, 256), jnp.float32, -lim2, lim2),
        "b2": jax.random.uniform(k4, (2,), jnp.float32, -lim2, lim2),
    }


def reference_forward(x_p, x_n, x_w, x_fea, params):
    """Pure-JAX reference mirroring the PyTorch forward (eval mode, two Linears)."""
    del x_w
    atten = jnp.sum(jnp.concatenate((x_p, x_n), axis=1), axis=1)[:, None, :, :]
    x_c_2 = atten * x_fea + x_fea
    B, C = x_c_2.shape[0], x_c_2.shape[1]
    pooled = jnp.mean(x_c_2.reshape(B, C, -1), axis=2)
    h = pooled @ params["w1"].T + params["b1"]
    return h @ params["w2"].T + params["b2"]


if __name__ == "__main__":
    key = jax.random.PRNGKey(0)
    kp, kn, kw, kf, kparam = jax.random.split(key, 5)

    B, C, H, W = 2, 2048, 8, 8        # C fixed at 2048 by Linear(2048, 256)
    Cp, Cn = 2, 2                     # small attention-channel counts

    x_p = jax.random.normal(kp, (B, Cp, H, W), jnp.float32)
    x_n = jax.random.normal(kn, (B, Cn, H, W), jnp.float32)
    x_w = jax.random.normal(kw, (B, 16), jnp.float32)   # unused by forward
    x_fea = jax.random.normal(kf, (B, C, H, W), jnp.float32)

    params = init_params(kparam)
    folded = jax.block_until_ready(prepare_params(params))   # one-time fold

    out = class_branch_2_forward(x_p, x_n, x_w, x_fea, folded)
    out = jax.block_until_ready(out)

    ref = jax.block_until_ready(reference_forward(x_p, x_n, x_w, x_fea, params))
    assert out.shape == (B, 2)
    np.testing.assert_allclose(np.asarray(out), np.asarray(ref), rtol=1e-4, atol=1e-4)

    print("KERNEL_OK")
</pallas_src>

<mosaic_0001>
module attributes {stable_mosaic.version = 11 : i64} {
  func.func @_class_branch_2_kernel(%arg0: i32, %arg1: i32, %arg2: memref<1x1x64xf32, #tpu.memory_space<vmem>>, %arg3: memref<1x512x64xf32, #tpu.memory_space<vmem>>, %arg4: memref<2x512xf32, #tpu.memory_space<vmem>>, %arg5: memref<1x1x2xf32, #tpu.memory_space<vmem>>, %arg6: memref<1x1x2xf32, #tpu.memory_space<vmem>>) attributes {dimension_semantics = [#tpu.dimension_semantics<parallel>, #tpu.dimension_semantics<arbitrary>], iteration_bounds = array<i64: 2, 4>, scalar_prefetch = 0 : i64, scratch_operands = 0 : i64, tpu.core_type = #tpu.core_type<tc>, window_params = [{transform_indices = @transform_0, window_bounds = array<i64: 1, 1, 64>}, {transform_indices = @transform_1, window_bounds = array<i64: 1, 512, 64>}, {transform_indices = @transform_2, window_bounds = array<i64: 2, 512>}, {pipeline_mode = #tpu.pipeline_mode<synchronous>, transform_indices = @transform_3, window_bounds = array<i64: 1, 1, 2>}, {transform_indices = @transform_4, window_bounds = array<i64: 1, 1, 2>}]} {
    %c0_i32 = arith.constant 0 : i32
    %0 = arith.cmpi eq, %arg1, %c0_i32 : i32
    %1 = arith.extui %0 : i1 to i32
    %c0_i32_0 = arith.constant 0 : i32
    %2 = arith.cmpi ne, %1, %c0_i32_0 : i32
    scf.if %2 {
      %c0_15 = arith.constant 0 : index
      %c0_16 = arith.constant 0 : index
      %c0_17 = arith.constant 0 : index
      %14 = vector.load %arg5[%c0_15, %c0_16, %c0_17] : memref<1x1x2xf32, #tpu.memory_space<vmem>>, vector<1x1x2xf32>
      %c0_18 = arith.constant 0 : index
      %c0_19 = arith.constant 0 : index
      %c0_20 = arith.constant 0 : index
      %15 = vector.load %arg6[%c0_18, %c0_19, %c0_20] : memref<1x1x2xf32, #tpu.memory_space<vmem>>, vector<1x1x2xf32>
      tpu.vector_store %arg6[%c0_18, %c0_19, %c0_20], %14 {strides = array<i32>} : memref<1x1x2xf32, #tpu.memory_space<vmem>>, vector<1x1x2xf32>,
    } else {
    }
    %c0 = arith.constant 0 : index
    %c0_1 = arith.constant 0 : index
    %3 = vector.load %arg4[%c0, %c0_1] : memref<2x512xf32, #tpu.memory_space<vmem>>, vector<2x512xf32>
    %c0_2 = arith.constant 0 : index
    %c0_3 = arith.constant 0 : index
    %c0_4 = arith.constant 0 : index
    %4 = vector.load %arg3[%c0_2, %c0_3, %c0_4] : memref<1x512x64xf32, #tpu.memory_space<vmem>>, vector<1x512x64xf32>
    %5 = vector.shape_cast %4 : vector<1x512x64xf32> to vector<512x64xf32>
    %cst = arith.constant dense<0.000000e+00> : vector<2x64xf32>
    %6 = tpu.matmul %3, %5, %cst {dimension_numbers = #tpu.dot_dimension_numbers<[1], [0], [0], [1], [0, 0, 1, 1], [], []>} : vector<2x512xf32>, vector<512x64xf32>, vector<2x64xf32> -> vector<2x64xf32>
    %c0_5 = arith.constant 0 : index
    %c0_6 = arith.constant 0 : index
    %c0_7 = arith.constant 0 : index
    %7 = vector.load %arg2[%c0_5, %c0_6, %c0_7] : memref<1x1x64xf32, #tpu.memory_space<vmem>>, vector<1x1x64xf32>
    %8 = vector.shape_cast %7 : vector<1x1x64xf32> to vector<1x64xf32>
    "tpu.trace_start"() <{level = 10 : i32, message = "xs,js->xj"}> : () -> ()
    %cst_8 = arith.constant dense<0.000000e+00> : vector<1x2xf32>
    %9 = tpu.matmul %8, %6, %cst_8 {dimension_numbers = #tpu.dot_dimension_numbers<[1], [1], [0], [0], [0, 0, 1, 0], [], []>} : vector<1x64xf32>, vector<2x64xf32>, vector<1x2xf32> -> vector<1x2xf32>
    "tpu.trace_stop"() : () -> ()
    %c0_9 = arith.constant 0 : index
    %c0_10 = arith.constant 0 : index
    %c0_11 = arith.constant 0 : index
    %10 = vector.load %arg6[%c0_9, %c0_10, %c0_11] : memref<1x1x2xf32, #tpu.memory_space<vmem>>, vector<1x1x2xf32>
    %11 = vector.shape_cast %9 : vector<1x2xf32> to vector<1x1x2xf32>
    %12 = arith.addf %10, %11 : vector<1x1x2xf32>
    %c0_12 = arith.constant 0 : index
    %c0_13 = arith.constant 0 : index
    %c0_14 = arith.constant 0 : index
    %13 = vector.load %arg6[%c0_12, %c0_13, %c0_14] : memref<1x1x2xf32, #tpu.memory_space<vmem>>, vector<1x1x2xf32>
    tpu.vector_store %arg6[%c0_12, %c0_13, %c0_14], %12 {strides = array<i32>} : memref<1x1x2xf32, #tpu.memory_space<vmem>>, vector<1x1x2xf32>,
    return
  }
  func.func @transform_0(%arg0: i32, %arg1: i32) -> (i32, i32, i32) {
    %c0_i32 = arith.constant 0 : i32
    %c0_i32_0 = arith.constant 0 : i32
    %c0_i32_1 = arith.constant 0 : i32
    return %arg0, %c0_i32, %c0_i32_0 : i32, i32, i32
  }
  func.func @transform_1(%arg0: i32, %arg1: i32) -> (i32, i32, i32) {
    %c0_i32 = arith.constant 0 : i32
    %c0_i32_0 = arith.constant 0 : i32
    return %arg0, %arg1, %c0_i32 : i32, i32, i32
  }
  func.func @transform_2(%arg0: i32, %arg1: i32) -> (i32, i32) {
    %c0_i32 = arith.constant 0 : i32
    %c0_i32_0 = arith.constant 0 : i32
    return %c0_i32, %arg1 : i32, i32
  }
  func.func @transform_3(%arg0: i32, %arg1: i32) -> (i32, i32, i32) {
    %c0_i32 = arith.constant 0 : i32
    %c0_i32_0 = arith.constant 0 : i32
    %c0_i32_1 = arith.constant 0 : i32
    %c0_i32_2 = arith.constant 0 : i32
    return %c0_i32, %c0_i32_0, %c0_i32_1 : i32, i32, i32
  }
  func.func @transform_4(%arg0: i32, %arg1: i32) -> (i32, i32, i32) {
    %c0_i32 = arith.constant 0 : i32
    %c0_i32_0 = arith.constant 0 : i32
    %c0_i32_1 = arith.constant 0 : i32
    return %arg0, %c0_i32, %c0_i32_0 : i32, i32, i32
  }
}

</mosaic_0001>

<bundles_post_ra>
// kernel: class_branch_2_forward.1
= control target key start
LH: loop header
LB: loop body
LE: loop exit
PB: predicated region body
PF: predicated region fallthrough
CT: control target
= control target key end

     0   :  { %9 = vsyncpa [#allocation3], 0  ;;  %s983_s0 = inlined_call_operand.vmem [shape: f32[2,1,64], index: 0, kind: input, shape index: {}]   ;;  %s984_s1 = inlined_call_operand.vmem [shape: f32[2,2048,64], index: 1, kind: input, shape index: {}]   ;;  %s985_s2 = inlined_call_operand.vmem [shape: f32[2,2048], index: 2, kind: input, shape index: {}]   ;;  %s986_s3 = inlined_call_operand.vmem [shape: f32[1,1,2], index: 3, kind: input, shape index: {}]   ;;  %s987_s4 = inlined_call_operand.hbm [shape: f32[2,1,2], index: 4, kind: output, shape index: {}]  }
   0x1   :  { %11 = vsyncpa [#allocation3 + $0x1], 0  ;;  %s766_s15 = smov 0   ;;  %s768_s16 = smov 0  }
   0x2   :  { %s770_s17 = smov 0   ;;  %s772_s18 = smov 0  }
   0x3   :  { %s774_s19 = smov 0   ;;  %s776_s20 = smov 0  }
   0x4   :  { %s778_s21 = smov 0   ;;  %s780_s22 = smov 0  }
   0x5 LB: > { %991 = sst [smem:[#allocation5_spill]] %s731_s20  ;;  %s559_s23 = sadd.s32 4294967295, %s739_s22   ;;  %s739_s22 = sphi %s780_s22, %s17_s22   ;;  %s735_s21 = sphi %s778_s21, %s1002_s21   ;;  %s731_s20 = sphi %s776_s20, %s1001_s20   ;;  %s727_s19 = sphi %s774_s19, %s1000_s19   ;;  %s723_s18 = sphi %s772_s18, %s999_s18   ;;  %s719_s17 = sphi %s770_s17, %s1005_s17   ;;  %s715_s16 = sphi %s768_s16, %s1004_s16   ;;  %s711_s15 = sphi %s766_s15, %s1003_s15  }
   0x6   : > { %992 = sst [smem:[#allocation6_spill]] %s735_s21  ;;  %s560_s24 = sadd.s32 4294967294, %s739_s22  }
   0x7   : > { %s26_s25 = sadd.s32 1, %s731_s20  ;;  %s29_s26 = sadd.s32 1, %s735_s21 }
   0x8   : > { %p27_p0 = scmp.ge.s32.totalorder %s26_s25, 4  ;;  %p147_p1 = scmp.ne.s32.totalorder %s719_s17, %s715_s16 }
   0x9   : > { %p148_p2 = scmp.eq.s32.totalorder %s559_s23, 7  ;;  %p153_p4 = scmp.ne.s32.totalorder %s715_s16, %s711_s15 }
   0xa   : > { %s1007_s25 = smov (%p27_p0, %s26_s25), 0  ;;  %s1009_s26 = smov (!%p27_p0, %s29_s26), %s735_s21 }
   0xb   : > { %993 = sst [smem:[#allocation7_spill]] %s1007_s25  ;;  %p815_p3 = por %p148_p2, %p147_p1 }
   0xc   : > { %p31_p5 = scmp.ge.s32.totalorder %s1009_s26, 2  ;;  %p154_p6 = scmp.eq.s32.totalorder %s560_s24, 7 }
   0xd   : > { %p563_p7 = scmp.ge.s32.totalorder %s739_s22, 1  ;;  %p203_p8 = scmp.lt.s32.totalorder %s739_s22, 9 }
   0xe   : > { %s1011_s26 = smov (%p31_p5, %s1009_s26), 0  ;;  %p825_p9 = por %p154_p6, %p153_p4 }
   0xf   : > { %995 = sst [smem:[#allocation8_spill]] %s1011_s26  ;;  %p204_p10 = pnand %p563_p7, %p203_p8 }
  0x10   : > { %s134_s29 = ssub.s32 %s735_s21, %s1011_s26  ;;  %s137_s30 = sadd.s32 1, %s719_s17 }
  0x11   : > { %p135_p11 = scmp.eq.s32.totalorder %s134_s29, 0  ;;  %207 = sbr.rel (%p204_p10) target bundleno = 340 (0x154), region = 36 }
  0x12   : > { %p240_p12 = scmp.lt.s32.totalorder (!%p204_p10), %s727_s19, 1  ;;  %s564_s7 = sshll.u32 (!%p204_p10), %s723_s18, 6 }
  0x13   : > { %s833_s5 = scalar_select %p135_p11, %s719_s17, %s137_s30  }
  0x14   : > { %p246_p13 = scmp.lt.s32.totalorder (!%p204_p10), %s564_s7, 255  ;;  %s567_s9 = sshll.u32 (!%p204_p10), %s723_s18, 2 }
  0x15   : > { %p254_p0 = scmp.lt.s32.totalorder (!%p204_p10), %s567_s9, 15  ;;  %s997_s20 = sand.u32 (!%p204_p10), 1, %s715_s16  }
  0x16   : > { %s839_s8 = scalar_select %p240_p12, %s727_s19, 1 }
  0x17   : > { %s1013_s7 = smov (!%p246_p13, %s564_s7), 255  ;;  %s1015_s9 = smov (!%p254_p0, %s567_s9), 15 }
  0x18   : > { %s242_s12 = scalar_lea.vmem %s983_s0, %s839_s8  ;;  %s565_s13 = sshll.u32 %s839_s8, 8 }
  0x19   : > { %s249_s14 = sadd.s32 %s565_s13, %s1013_s7  ;;  %s568_s6 = sshll.u32 %s1015_s9, 1 }
  0x1a   : > { %s566_s23 = sshll.u32 %s249_s14, 3  ;;  %s855_s21 = scalar_lea.vmem %s985_s2, %s568_s6 }
  0x1b   : > { %s850_s30 = scalar_lea.vmem %s984_s1, %s566_s23  ;;  %s859_s10 = scalar_lea.vmem [#allocation2], %s997_s20 }
  0x1c   : > { %p569_p1 = scmp.ne.s32.totalorder %s723_s18, 0 }
  0x1e   : > { %262 = sbr.rel (%p569_p1) target bundleno = 37 (0x25), region = 40 }
  0x23   : > { %v263_v0 = vld [vmem:[%s986_s3] sm:$0x1]  ;;  %vm264_vm0 = vcmask 8192  }
  0x24   : > { %265 = vst.msk [vmem:[%s859_s10] sm:$0x1] %vm264_vm0, %v263_v0 }
  0x25 PF: > { %v314_v1 = vld [vmem:[%s850_s30 + $0x178] sm:$0xff]  ;;  %v313_v2 = vld [vmem:[%s850_s30 + $0x170] sm:$0xff]  ;;  %v312_v6 = vld [vmem:[%s850_s30 + $0x168] sm:$0xff]  ;;  %vm422_vm1 = vcmask 523264   ;;  %s462_s26 = scalar_lea.hbm %s987_s4, %s727_s19  ;;  %s464_s6 = sshll.u32 %s859_s10, 4  ;;  %vm451_vm2 = vcmask 8192   ;;  %s465_s6 = int_to_ptr.vmem [resolvable:$true] %s464_s6 }
  0x26   : > { %v330_v3 = vld [vmem:[%s850_s30 + $0x1f8] sm:$0xff]  ;;  %381 = vmatpush.msra.mxu2 %v314_v1  ;;  %v329_v7 = vld [vmem:[%s850_s30 + $0x1f0] sm:$0xff]  ;;  %v328_v10 = vld [vmem:[%s850_s30 + $0x1e8] sm:$0xff]  ;;  %s466_s9 = sshll.u32 %s462_s26, 4  ;;  %s998_s13 = sand.u32 1, %s715_s16   ;;  %s467_s9 = int_to_ptr.hbm [resolvable:$true] %s466_s9 }
  0x27   : > { %401 = vmatpush.msra.mxu3 %v330_v3  ;;  %v282_v4 = vld [vmem:[%s850_s30 + $0x78] sm:$0xff]  ;;  %v281_v8 = vld [vmem:[%s850_s30 + $0x70] sm:$0xff]  ;;  %v280_v11 = vld [vmem:[%s850_s30 + $0x68] sm:$0xff]  ;;  %s454_s14 = scalar_lea.sflag [#allocation3], %s998_s13  ;;  %s659_s23 = sshra.s32 %s467_s9, 4  ;;  %s660_s23 = int_to_ptr.hbm [resolvable:$true] %s659_s23 }
  0x28   : > { %v298_v5 = vld [vmem:[%s850_s30 + $0xf8] sm:$0xff]  ;;  %341 = vmatpush.msra.mxu0 %v282_v4  ;;  %v297_v9 = vld [vmem:[%s850_s30 + $0xf0] sm:$0xff]  ;;  %382 = vmatpush.msra.mxu2 %v313_v2  ;;  %v311_v12 = vld [vmem:[%s850_s30 + $0x160] sm:$0xff]  ;;  %s661_s8 = scalar_lea.hbm %s660_s23, 1  ;;  %s665_s24 = scalar_lea.hbm %s987_s4, 2 }
  0x29   : > { %361 = vmatpush.msra.mxu1 %v298_v5  ;;  %402 = vmatpush.msra.mxu3 %v329_v7  ;;  %v296_v13 = vld [vmem:[%s850_s30 + $0xe8] sm:$0xff]  ;;  %v327_v14 = vld [vmem:[%s850_s30 + $0x1e0] sm:$0xff]  ;;  %v310_v17 = vld [vmem:[%s850_s30 + $0x158] sm:$0xff]  ;;  %p662_p2 = scmp.ne.s32.totalorder %s660_s23, %s661_s8  ;;  %p666_p6 = scmp.lt.s32.totalorder %s660_s23, %s987_s4 }
  0x2a   : > { %342 = vmatpush.msra.mxu0 %v281_v8  ;;  %383 = vmatpush.msra.mxu2 %v312_v6  ;;  %v279_v15 = vld [vmem:[%s850_s30 + $0x60] sm:$0xff]  ;;  %v326_v18 = vld [vmem:[%s850_s30 + $0x1d8] sm:$0xff]  ;;  %v309_v21 = vld [vmem:[%s850_s30 + $0x150] sm:$0xff]  ;;  %p667_p7 = scmp.lt.s32.totalorder %s665_s24, %s661_s8 }
  0x2b   : > { %362 = vmatpush.msra.mxu1 %v297_v9  ;;  %403 = vmatpush.msra.mxu3 %v328_v10  ;;  %v295_v16 = vld [vmem:[%s850_s30 + $0xe0] sm:$0xff]  ;;  %v278_v19 = vld [vmem:[%s850_s30 + $0x58] sm:$0xff]  ;;  %v325_v22 = vld [vmem:[%s850_s30 + $0x1d0] sm:$0xff]  ;;  %p663_p4 = pnand %p662_p2, %p815_p3 }
  0x2c   : > { %343 = vmatpush.msra.mxu0 %v280_v11  ;;  %384 = vmatpush.msra.mxu2 %v311_v12  ;;  %v294_v20 = vld [vmem:[%s850_s30 + $0xd8] sm:$0xff]  ;;  %v277_v23 = vld [vmem:[%s850_s30 + $0x50] sm:$0xff]  ;;  %v308_v25 = vld [vmem:[%s850_s30 + $0x148] sm:$0xff]  ;;  %p668_p8 = por %p667_p7, %p666_p6 }
  0x2d   : > { %363 = vmatpush.msra.mxu1 %v296_v13  ;;  %404 = vmatpush.msra.mxu3 %v327_v14  ;;  %v293_v24 = vld [vmem:[%s850_s30 + $0xd0] sm:$0xff]  ;;  %v324_v26 = vld [vmem:[%s850_s30 + $0x1c8] sm:$0xff]  ;;  %v307_v29 = vld [vmem:[%s850_s30 + $0x140] sm:$0xff]  ;;  %p664_p5 = pneg %p663_p4 }
  0x2e   : > { %344 = vmatpush.msra.mxu0 %v279_v15  ;;  %385 = vmatpush.msra.mxu2 %v310_v17  ;;  %v276_v27 = vld [vmem:[%s850_s30 + $0x48] sm:$0xff]  ;;  %v323_v30 = vld [vmem:[%s850_s30 + $0x1c0] sm:$0xff]  ;;  %v306_v33 = vld [vmem:[%s850_s30 + $0x138] sm:$0xff] }
  0x2f   : > { %364 = vmatpush.msra.mxu1 %v295_v16  ;;  %405 = vmatpush.msra.mxu3 %v326_v18  ;;  %v292_v28 = vld [vmem:[%s850_s30 + $0xc8] sm:$0xff]  ;;  %v275_v31 = vld [vmem:[%s850_s30 + $0x40] sm:$0xff]  ;;  %v322_v34 = vld [vmem:[%s850_s30 + $0x1b8] sm:$0xff]  ;;  %p669_p10 = pnand %p668_p8, %p664_p5 }
  0x30   : > { %345 = vmatpush.msra.mxu0 %v278_v19  ;;  %386 = vmatpush.msra.mxu2 %v309_v21  ;;  %v291_v32 = vld [vmem:[%s850_s30 + $0xc0] sm:$0xff]  ;;  %v274_v35 = vld [vmem:[%s850_s30 + $0x38] sm:$0xff]  ;;  %v305_v37 = vld [vmem:[%s850_s30 + $0x130] sm:$0xff] }
  0x31   : > { %365 = vmatpush.msra.mxu1 %v294_v20  ;;  %406 = vmatpush.msra.mxu3 %v325_v22  ;;  %v290_v36 = vld [vmem:[%s850_s30 + $0xb8] sm:$0xff]  ;;  %v321_v38 = vld [vmem:[%s850_s30 + $0x1b0] sm:$0xff]  ;;  %v304_v41 = vld [vmem:[%s850_s30 + $0x128] sm:$0xff] }
  0x32   : > { %346 = vmatpush.msra.mxu0 %v277_v23  ;;  %387 = vmatpush.msra.mxu2 %v308_v25  ;;  %v273_v39 = vld [vmem:[%s850_s30 + $0x30] sm:$0xff]  ;;  %v320_v42 = vld [vmem:[%s850_s30 + $0x1a8] sm:$0xff]  ;;  %v266_v45 = vld [vmem:[%s855_s21] sm:$0xff] }
  0x33   : > { %366 = vmatpush.msra.mxu1 %v293_v24  ;;  %407 = vmatpush.msra.mxu3 %v324_v26  ;;  %v289_v40 = vld [vmem:[%s850_s30 + $0xb0] sm:$0xff]  ;;  %v272_v43 = vld [vmem:[%s850_s30 + $0x28] sm:$0xff]  ;;  %v303_v46 = vld [vmem:[%s850_s30 + $0x120] sm:$0xff]  ;;  %332 = vst [vmem:[#allocation1] ss:$4 sm:$0xff] %v266_v45 }
  0x34   : > { %347 = vmatpush.msra.mxu0 %v276_v27  ;;  %388 = vmatpush.msra.mxu2 %v307_v29  ;;  %v288_v44 = vld [vmem:[%s850_s30 + $0xa8] sm:$0xff]  ;;  %v319_v47 = vld [vmem:[%s850_s30 + $0x1a0] sm:$0xff]  ;;  %v302_v50 = vld [vmem:[%s850_s30 + $0x118] sm:$0xff] }
  0x35   : > { %367 = vmatpush.msra.mxu1 %v292_v28  ;;  %408 = vmatpush.msra.mxu3 %v323_v30  ;;  %v271_v48 = vld [vmem:[%s850_s30 + $0x20] sm:$0xff]  ;;  %v318_v51 = vld [vmem:[%s850_s30 + $0x198] sm:$0xff]  ;;  %v301_v54 = vld [vmem:[%s850_s30 + $0x110] sm:$0xff] }
  0x36   : > { %348 = vmatpush.msra.mxu0 %v275_v31  ;;  %389 = vmatpush.msra.mxu2 %v306_v33  ;;  %v287_v49 = vld [vmem:[%s850_s30 + $0xa0] sm:$0xff]  ;;  %v270_v52 = vld [vmem:[%s850_s30 + $0x18] sm:$0xff]  ;;  %v317_v55 = vld [vmem:[%s850_s30 + $0x190] sm:$0xff] }
  0x37   : > { %368 = vmatpush.msra.mxu1 %v291_v32  ;;  %409 = vmatpush.msra.mxu3 %v322_v34  ;;  %v286_v53 = vld [vmem:[%s850_s30 + $0x98] sm:$0xff]  ;;  %v269_v56 = vld [vmem:[%s850_s30 + $0x10] sm:$0xff]  ;;  %v300_v58 = vld [vmem:[%s850_s30 + $0x108] sm:$0xff] }
  0x38   : > { %349 = vmatpush.msra.mxu0 %v274_v35  ;;  %390 = vmatpush.msra.mxu2 %v305_v37  ;;  %v285_v57 = vld [vmem:[%s850_s30 + $0x90] sm:$0xff]  ;;  %v316_v59 = vld [vmem:[%s850_s30 + $0x188] sm:$0xff]  ;;  %v299_v62 = vld [vmem:[%s850_s30 + $0x100] sm:$0xff] }
  0x39   : > { %369 = vmatpush.msra.mxu1 %v290_v36  ;;  %410 = vmatpush.msra.mxu3 %v321_v38  ;;  %v268_v60 = vld [vmem:[%s850_s30 + $0x8] sm:$0xff]  ;;  %v315_v63 = vld [vmem:[%s850_s30 + $0x180] sm:$0xff] }
  0x3a   : > { %350 = vmatpush.msra.mxu0 %v273_v39  ;;  %391 = vmatpush.msra.mxu2 %v304_v41  ;;  %v284_v61 = vld [vmem:[%s850_s30 + $0x88] sm:$0xff]  ;;  %v335_v0 = vld.sshfl [vmem:[#allocation1 + $0x10] sm:$0xff pattern:$0x73625140]  ;;  %v267_v2 = vld [vmem:[%s850_s30] sm:$0xff] }
  0x3b   : > { %370 = vmatpush.msra.mxu1 %v289_v40  ;;  %411 = vmatpush.msra.mxu3 %v320_v42  ;;  %v336_v1 = vld.sshfl [vmem:[#allocation1 + $0x18] sm:$0xff pattern:$0x73625140]  ;;  %v283_v3 = vld [vmem:[%s850_s30 + $0x80] sm:$0xff] }
  0x3c   : > { %351 = vmatpush.msra.mxu0 %v272_v43  ;;  %392 = vmatpush.msra.mxu2 %v303_v46  ;;  %v333_v4 = vld.sshfl [vmem:[#allocation1] sm:$0xff pattern:$0x73625140]  ;;  %v334_v5 = vld.sshfl [vmem:[#allocation1 + $0x8] sm:$0xff pattern:$0x73625140] }
  0x3d   : > { %371 = vmatpush.msra.mxu1 %v288_v44  ;;  %412 = vmatpush.msra.mxu3 %v319_v47  ;;  %v421_v13 = vld [vmem:[%s242_s12] sm:$0x1] }
  0x3e   : > { %352 = vmatpush.msra.mxu0 %v271_v48  ;;  %393 = vmatpush.msra.mxu2 %v302_v50  ;;  %v449_v14 = vld [vmem:[%s859_s10] sm:$0x1] }
  0x3f   : > { %372 = vmatpush.msra.mxu1 %v287_v49  ;;  %413 = vmatpush.msra.mxu3 %v318_v51 }
  0x40   : > { %353 = vmatpush.msra.mxu0 %v270_v52  ;;  %394 = vmatpush.msra.mxu2 %v301_v54 }
  0x41   : > { %373 = vmatpush.msra.mxu1 %v286_v53  ;;  %414 = vmatpush.msra.mxu3 %v317_v55 }
  0x42   : > { %354 = vmatpush.msra.mxu0 %v269_v56  ;;  %395 = vmatpush.msra.mxu2 %v300_v58 }
  0x43   : > { %374 = vmatpush.msra.mxu1 %v285_v57  ;;  %415 = vmatpush.msra.mxu3 %v316_v59 }
  0x44   : > { %355 = vmatpush.msra.mxu0 %v268_v60  ;;  %396 = vmatpush.msra.mxu2 %v299_v62 }
  0x45   : > { %375 = vmatpush.msra.mxu1 %v284_v61  ;;  %416 = vmatpush.msra.mxu3 %v315_v63 }
  0x46   : > { %397 = vmatmul.f32.vlgmr.msra.gmra.mxu2 %v335_v0  ;;  %417 = vmatmul.f32.vlgmr.msra.gmra.mxu3 %v336_v1 }
  0x47   : > { %356 = vmatpush.msra.mxu0 %v267_v2  ;;  %376 = vmatpush.msra.mxu1 %v283_v3 }
  0x48   : > { %357 = vmatmul.f32.vlgmr.msra.gmra.mxu0 %v333_v4  ;;  %377 = vmatmul.f32.vlgmr.msra.gmra.mxu1 %v334_v5 }
  0xc5   : > { %v358_v6 = vpop.f32.mrf.mxu0  ;;  %v378_v7 = vpop.f32.mrf.mxu1 }
  0xc6   : > { %v379_v8 = vadd.f32 %v378_v7, %v358_v6 }
  0xc9   : > { %v398_v9 = vpop.f32.mrf.mxu2  ;;  %v418_v10 = vpop.f32.mrf.mxu3 }
  0xca   : > { %v399_v11 = vadd.f32 %v398_v9, %v379_v8 }
  0xcc   : > { %v419_v12 = vadd.f32 %v418_v10, %v399_v11 }
  0xce   : > { %570 = vmatpush.xpose.msk.msrb.mxu0 %vm422_vm1, %v419_v12 }
  0xd1   : > { %571 = vmatmul.msk.f32.vlgmr.msrb.gmra.mxu0 %vm422_vm1, %v421_v13 }
 0x14e   : > { %v446_v15 = vpop.f32.mrf.mxu0 }
 0x14f   : > { %v450_v16 = vadd.f32 %v449_v14, %v446_v15 }
 0x151   : > { %452 = vst.msk [vmem:[%s859_s10] sm:$0x1] %vm451_vm2, %v450_v16 }
 0x152   : > { %672 = shalt.err (!%p669_p10)
}
 0x153   : > { %574 = dma.vmem_to_hbm [thread:$0]  (%p815_p3), %s465_s6, 16, %s467_s9, %s454_s14  }
 0x154 PF: > { %p580_p11 = scmp.ge.s32.totalorder %s739_s22, 2  ;;  %s478_s10 = sand.u32 1, %s711_s15  }
 0x155   : > { %s479_s7 = scalar_lea.sflag [#allocation3], %s478_s10 }
 0x156   : > { %p577_p12 = pnand %p580_p11, %p825_p9 }
 0x158   : > { %p578_p13 = pneg %p577_p12 }
 0x15a   : > { %706 = dma.done.wait (%p578_p13), %s479_s7, 16  }
 0x15b   : > { %708 = vsyncadd (%p578_p13), %s479_s7, 4294967280  ;;  %s17_s22 = sadd.s32 1, %s739_s22   ;;  %s999_s18 = sld [smem:[#allocation5_spill]] }
 0x15c   : > { %p14_p0 = scmp.ge.s32.totalorder %s17_s22, 10   ;;  %s1000_s19 = sld [smem:[#allocation6_spill]] }
 0x15d   : > { %s1001_s20 = sld [smem:[#allocation7_spill]]  ;;  %s1003_s15 = smov %s715_s16 }
 0x15e   : > { %s1002_s21 = sld [smem:[#allocation8_spill]]  ;;  %s1004_s16 = smov %s719_s17 }
 0x15f   : > { %s1005_s17 = smov %s833_s5  ;;  %16 = sbr.rel (!%p14_p0) target bundleno = 5 (0x5), region = 81 }
 0x164   :  { %484 = vsyncpa [#allocation3], 1 }
 0x165   :  { %486 = vsyncpa [#allocation3 + $0x1], 1 }

</bundles_post_ra>
